<compile_context>
chip_gen: v7x
topology: tpu7x:2x2x1
jax: 0.10.0
libtpu: 0.0.40
codegen_flags: <defaults>
</compile_context>

<pallas_src>
import functools

import jax
import jax.numpy as jnp
from jax import lax
from jax.experimental import pallas as pl
from jax.experimental.pallas import tpu as pltpu


def _round_up(x, m):
    return ((x + m - 1) // m) * m


def _rgc_loss_kernel(a_ref, cT_ref, w_ref, posf_ref, posw_ref, loss_ref, *,
                     inv_t, b_pad, pad_rows, n_nbr):
    tm = a_ref.shape[0]
    a = a_ref[...]                                   # [tm, dim]  (matmul dtype)
    af = a.astype(jnp.float32)

    def block_dot(j):
        # [tm, dim] x [dim, b_pad] -> [tm, b_pad], f32 accumulate; RHS already
        # pre-transposed in the wrapper so no in-kernel transpose is needed.
        d = lax.dot_general(
            a, cT_ref[:, j * b_pad:(j + 1) * b_pad],
            dimension_numbers=(((1,), (0,)), ((), ())),
            preferred_element_type=jnp.float32)
        return d * inv_t

    def block_sum(j, d, m):
        e = jnp.exp(d - m)
        if j >= 2:
            # Neighbor block: streamed weights (zero-padded columns -> weight 0).
            e = e * w_ref[:, (j - 2) * b_pad:(j - 1) * b_pad].astype(jnp.float32)
            return jnp.sum(e, axis=1, keepdims=True)
        # Anchor / pair block: implicit weight 1.  Zero-padded tail columns have
        # dot exactly 0, contributing exp(-m) each — remove them analytically.
        s = jnp.sum(e, axis=1, keepdims=True)
        if pad_rows:
            s = s - float(pad_rows) * jnp.exp(-m)
        return s

    # Online softmax over (2 + n_nbr) column blocks of width b_pad each:
    #   block 0 = anchor columns, block 1 = pair columns, blocks 2.. = neighbors.
    d = block_dot(0)
    m = jnp.max(d, axis=1, keepdims=True)            # includes self-dot >= 0
    s_tot = block_sum(0, d, m)
    for j in range(1, 2 + n_nbr):                     # static unroll (small)
        d = block_dot(j)
        m_new = jnp.maximum(m, jnp.max(d, axis=1, keepdims=True))
        s_tot = s_tot * jnp.exp(m - m_new) + block_sum(j, d, m_new)
        m = m_new

    # Positives: pair (k=0) and each neighbor (k>=1) via aligned row slices
    # (elementwise multiply + lane reduce, no full-width masks).
    s_pos = jnp.zeros((tm, 1), jnp.float32)
    for k in range(n_nbr + 1):                        # static unroll (small)
        d_pos = jnp.sum(af * posf_ref[:, k, :].astype(jnp.float32),
                        axis=1, keepdims=True) * inv_t
        s_pos = s_pos + posw_ref[:, k:k + 1].astype(jnp.float32) * jnp.exp(d_pos - m)

    # -log(s_pos / (s_tot - s_pos)) == log(denom) - log(s_pos)
    loss = jnp.log(s_tot - s_pos) - jnp.log(s_pos)    # [tm, 1]

    # Lane-dense writeback: relayout [tm, 1] -> [1, tm] with a diagonal select +
    # sublane reduce (cheap, avoids masked tiny stores on the output).
    r = lax.broadcasted_iota(jnp.int32, (tm, tm), 0)
    c = lax.broadcasted_iota(jnp.int32, (tm, tm), 1)
    loss_ref[0] = jnp.sum(jnp.where(r == c, loss, 0.0), axis=0, keepdims=True)


def rgc_loss(features, neighbor_topk_features, neighbor_weights, neighbor_num,
             temperature, *, block_rows=None, matmul_dtype=None):
    """features: [b, 2, dim]; neighbor_topk_features: [nn*b, dim];
    neighbor_weights: [b, nn*b].  Returns scalar loss (f32)."""
    b, n, dim = features.shape
    assert n == 2
    nn = int(neighbor_num)
    assert nn >= 1
    # TODO(synk): the `neighbor_topk_features is None` / `neighbor_weights is None`
    # branches (plain SimCLR, no neighbors) are not implemented by this kernel.
    assert neighbor_topk_features is not None and neighbor_weights is not None
    assert neighbor_topk_features.shape == (nn * b, dim)
    assert neighbor_weights.shape == (b, nn * b)

    feat_dtype = features.dtype if matmul_dtype is None else matmul_dtype
    anchor = features[:, 0].astype(feat_dtype)        # [b, dim]
    pair = features[:, 1].astype(feat_dtype)          # [b, dim]
    nbr = neighbor_topk_features.astype(feat_dtype)   # [nn*b, dim]
    w = neighbor_weights                              # keep input dtype; cast in kernel

    # Row-tile size: 256 default (128 suits v5e's 128x128 MXU), exact for tiny b.
    if block_rows is not None:
        tm = int(block_rows)
    elif b >= 256:
        tm = 256
    elif b >= 128:
        tm = 128
    else:
        tm = _round_up(b, 8)
    n_tiles = -(-b // tm)
    b_pad = n_tiles * tm
    pad_r = b_pad - b

    # Re-stride everything onto b_pad so every positive lands on an aligned diagonal
    # and every contrast column block has width b_pad.
    anchor_p = jnp.pad(anchor, ((0, pad_r), (0, 0)))                    # [b_pad, dim]
    pair_p = jnp.pad(pair, ((0, pad_r), (0, 0)))                        # [b_pad, dim]
    nbr3 = nbr.reshape(nn, b, dim)
    nbr3_p = jnp.pad(nbr3, ((0, 0), (0, pad_r), (0, 0)))                # [nn, b_pad, dim]
    contrast_p = jnp.concatenate(
        [anchor_p, pair_p, nbr3_p.reshape(nn * b_pad, dim)], axis=0)
    contrastT = contrast_p.T                                            # [dim, (2+nn)*b_pad]

    w3 = w.reshape(b, nn, b)
    w3_p = jnp.pad(w3, ((0, pad_r), (0, 0), (0, pad_r)))
    w_p = w3_p.reshape(b_pad, nn * b_pad)                               # [b_pad, nn*b_pad]

    # Positive feature rows: [b_pad, nn+1, dim]  (pair first, then each neighbor k).
    pos_feats = jnp.concatenate(
        [pair_p[:, None, :], jnp.transpose(nbr3_p, (1, 0, 2))], axis=1)
    # Positive weights: pair weight is 1; neighbor weights are w[r, k*b + r].
    ridx = jnp.arange(b)
    w_diag = w3[ridx, :, ridx]                                          # [b, nn]
    pos_w = jnp.concatenate(
        [jnp.ones((b, 1), dtype=w.dtype), w_diag.astype(w.dtype)], axis=1)
    pos_w = jnp.pad(pos_w, ((0, pad_r), (0, 0)))                        # [b_pad, nn+1]

    n_cols_all = (2 + nn) * b_pad

    # VMEM budget: residents + double-buffered streamed tiles + live f32 slabs,
    # capped at ~85% of the chip's physical VMEM.
    it = jnp.dtype(feat_dtype).itemsize
    wit = jnp.dtype(w.dtype).itemsize
    est = (2 * dim * n_cols_all * it                # resident contrast^T (x2 buffers)
           + 2 * tm * dim * it                      # anchor row tile (x2)
           + 2 * tm * nn * b_pad * wit              # weight row tile (x2)
           + 2 * tm * (nn + 1) * dim * it           # positive feature rows (x2)
           + 4 * tm * 128 * 4                       # positive weights + output (lane pad)
           + 6 * tm * b_pad * 4                     # live f32 intermediates per block
           + tm * tm * 4 + 64 * 1024)               # diag-select slab + slack
    try:
        vmem_cap = int(pltpu.get_tpu_info().vmem_capacity_bytes)
    except Exception:  # pragma: no cover - fallback when hardware query unavailable
        vmem_cap = 128 * 1024 * 1024
    vmem_limit = int(min(int(0.85 * vmem_cap),
                         max(32 * 1024 * 1024, int(1.5 * est))))

    kernel = functools.partial(
        _rgc_loss_kernel,
        inv_t=1.0 / float(temperature),
        b_pad=b_pad, pad_rows=pad_r, n_nbr=nn)

    row_loss = pl.pallas_call(
        kernel,
        out_shape=jax.ShapeDtypeStruct((n_tiles, 1, tm), jnp.float32),
        grid=(n_tiles,),
        in_specs=[
            pl.BlockSpec((tm, dim), lambda i: (i, 0)),              # anchor rows (streamed)
            pl.BlockSpec((dim, n_cols_all), lambda i: (0, 0)),      # contrast^T (resident)
            pl.BlockSpec((tm, nn * b_pad), lambda i: (i, 0)),       # neighbor weights rows
            pl.BlockSpec((tm, nn + 1, dim), lambda i: (i, 0, 0)),   # positive feature rows
            pl.BlockSpec((tm, nn + 1), lambda i: (i, 0)),           # positive weights
        ],
        out_specs=pl.BlockSpec((1, 1, tm), lambda i: (i, 0, 0)),    # lane-dense losses
        compiler_params=pltpu.CompilerParams(
            dimension_semantics=("parallel",),
            vmem_limit_bytes=vmem_limit),
    )(anchor_p, contrastT, w_p, pos_feats, pos_w)

    return jnp.mean(row_loss.reshape(b_pad)[:b])


def _rgc_loss_ref(features, neighbor_topk_features, neighbor_weights,
                  neighbor_num, temperature):
    """Pure-JAX reference mirroring the PyTorch forward, for verification."""
    b, n, dim = features.shape
    anchor = features[:, 0]
    contrast = jnp.concatenate(
        [features[:, 0], features[:, 1], neighbor_topk_features], axis=0)
    dot = (anchor @ contrast.T) / temperature
    logits = dot - jnp.max(dot, axis=1, keepdims=True)
    eye = jnp.eye(b, dtype=jnp.float32)
    mask = jnp.concatenate(
        [jnp.zeros((b, b))] + [eye] * (neighbor_num + 1), axis=1)
    weights = jnp.concatenate(
        [jnp.ones((b, b)), jnp.ones((b, b)), neighbor_weights], axis=1)
    exp_logits = jnp.exp(logits) * weights
    prob = exp_logits / jnp.sum((1.0 - mask) * exp_logits, axis=1, keepdims=True)
    return -jnp.mean(jnp.log(jnp.sum(mask * prob, axis=1)))


if __name__ == "__main__":
    b, dim = 8, 128
    neighbor_num = 3
    temperature = 0.5

    key = jax.random.PRNGKey(0)
    k1, k2, k3 = jax.random.split(key, 3)
    # Unit-normalized features (as in SimCLR usage) keep the loss finite so the
    # kernel-vs-reference comparison is meaningful.
    features = jax.random.normal(k1, (b, 2, dim), dtype=jnp.float32)
    features = features / jnp.linalg.norm(features, axis=-1, keepdims=True)
    neighbor_topk_features = jax.random.normal(
        k2, (neighbor_num * b, dim), dtype=jnp.float32)
    neighbor_topk_features = neighbor_topk_features / jnp.linalg.norm(
        neighbor_topk_features, axis=-1, keepdims=True)
    neighbor_weights = jax.random.uniform(
        k3, (b, neighbor_num * b), dtype=jnp.float32, minval=0.1, maxval=1.0)

    loss = rgc_loss(features, neighbor_topk_features, neighbor_weights,
                    neighbor_num, temperature)
    loss = jax.block_until_ready(loss)

    ref = _rgc_loss_ref(features, neighbor_topk_features, neighbor_weights,
                        neighbor_num, temperature)
    assert jnp.allclose(loss, ref, rtol=1e-4, atol=1e-4), (loss, ref)

    print("KERNEL_OK")
</pallas_src>

<mosaic_0001>
module attributes {stable_mosaic.version = 11 : i64} {
  func.func @_rgc_loss_kernel(%arg0: i32, %arg1: memref<8x128xf32, #tpu.memory_space<vmem>>, %arg2: memref<128x40xf32, #tpu.memory_space<vmem>>, %arg3: memref<8x24xf32, #tpu.memory_space<vmem>>, %arg4: memref<8x4x128xf32, #tpu.memory_space<vmem>>, %arg5: memref<8x4xf32, #tpu.memory_space<vmem>>, %arg6: memref<1x1x8xf32, #tpu.memory_space<vmem>>) attributes {dimension_semantics = [#tpu.dimension_semantics<parallel>], iteration_bounds = array<i64: 1>, scalar_prefetch = 0 : i64, scratch_operands = 0 : i64, tpu.core_type = #tpu.core_type<tc>, window_params = [{transform_indices = @transform_0, window_bounds = array<i64: 8, 128>}, {pipeline_mode = #tpu.pipeline_mode<synchronous>, transform_indices = @transform_1, window_bounds = array<i64: 128, 40>}, {transform_indices = @transform_2, window_bounds = array<i64: 8, 24>}, {transform_indices = @transform_3, window_bounds = array<i64: 8, 4, 128>}, {transform_indices = @transform_4, window_bounds = array<i64: 8, 4>}, {transform_indices = @transform_5, window_bounds = array<i64: 1, 1, 8>}]} {
    %c0 = arith.constant 0 : index
    %c0_0 = arith.constant 0 : index
    %0 = vector.load %arg1[%c0, %c0_0] : memref<8x128xf32, #tpu.memory_space<vmem>>, vector<8x128xf32>
    %c0_1 = arith.constant 0 : index
    %c0_2 = arith.constant 0 : index
    %1 = vector.load %arg2[%c0_1, %c0_2] : memref<128x40xf32, #tpu.memory_space<vmem>>, vector<128x8xf32>
    %cst = arith.constant dense<0.000000e+00> : vector<8x8xf32>
    %2 = tpu.matmul %0, %1, %cst {dimension_numbers = #tpu.dot_dimension_numbers<[1], [0], [0], [1], [0, 0, 1, 1], [], []>} : vector<8x128xf32>, vector<128x8xf32>, vector<8x8xf32> -> vector<8x8xf32>
    %cst_3 = arith.constant 2.000000e+00 : f32
    %3 = vector.broadcast %cst_3 : f32 to vector<8x8xf32>
    %4 = arith.mulf %2, %3 : vector<8x8xf32>
    %cst_4 = arith.constant dense<0xFF800000> : vector<8xf32>
    %5 = vector.multi_reduction <maximumf>, %4, %cst_4 [1] : vector<8x8xf32> to vector<8xf32>
    %6 = vector.shape_cast %5 : vector<8xf32> to vector<8x1xf32>
    %7 = vector.broadcast %6 : vector<8x1xf32> to vector<8x8xf32>
    %8 = arith.subf %4, %7 : vector<8x8xf32>
    %9 = math.exp %8 : vector<8x8xf32>
    %cst_5 = arith.constant dense<0.000000e+00> : vector<8xf32>
    %10 = vector.multi_reduction <add>, %9, %cst_5 [1] : vector<8x8xf32> to vector<8xf32>
    %11 = vector.shape_cast %10 : vector<8xf32> to vector<8x1xf32>
    %c0_6 = arith.constant 0 : index
    %c8 = arith.constant 8 : index
    %12 = vector.load %arg2[%c0_6, %c8] : memref<128x40xf32, #tpu.memory_space<vmem>>, vector<128x8xf32>
    %cst_7 = arith.constant dense<0.000000e+00> : vector<8x8xf32>
    %13 = tpu.matmul %0, %12, %cst_7 {dimension_numbers = #tpu.dot_dimension_numbers<[1], [0], [0], [1], [0, 0, 1, 1], [], []>} : vector<8x128xf32>, vector<128x8xf32>, vector<8x8xf32> -> vector<8x8xf32>
    %cst_8 = arith.constant 2.000000e+00 : f32
    %14 = vector.broadcast %cst_8 : f32 to vector<8x8xf32>
    %15 = arith.mulf %13, %14 : vector<8x8xf32>
    %cst_9 = arith.constant dense<0xFF800000> : vector<8xf32>
    %16 = vector.multi_reduction <maximumf>, %15, %cst_9 [1] : vector<8x8xf32> to vector<8xf32>
    %17 = vector.shape_cast %16 : vector<8xf32> to vector<8x1xf32>
    %18 = arith.maximumf %6, %17 : vector<8x1xf32>
    %19 = arith.subf %6, %18 : vector<8x1xf32>
    %20 = math.exp %19 : vector<8x1xf32>
    %21 = arith.mulf %11, %20 : vector<8x1xf32>
    %22 = vector.broadcast %18 : vector<8x1xf32> to vector<8x8xf32>
    %23 = arith.subf %15, %22 : vector<8x8xf32>
    %24 = math.exp %23 : vector<8x8xf32>
    %cst_10 = arith.constant dense<0.000000e+00> : vector<8xf32>
    %25 = vector.multi_reduction <add>, %24, %cst_10 [1] : vector<8x8xf32> to vector<8xf32>
    %26 = vector.shape_cast %25 : vector<8xf32> to vector<8x1xf32>
    %27 = arith.addf %21, %26 : vector<8x1xf32>
    %c0_11 = arith.constant 0 : index
    %c16 = arith.constant 16 : index
    %28 = vector.load %arg2[%c0_11, %c16] : memref<128x40xf32, #tpu.memory_space<vmem>>, vector<128x8xf32>
    %cst_12 = arith.constant dense<0.000000e+00> : vector<8x8xf32>
    %29 = tpu.matmul %0, %28, %cst_12 {dimension_numbers = #tpu.dot_dimension_numbers<[1], [0], [0], [1], [0, 0, 1, 1], [], []>} : vector<8x128xf32>, vector<128x8xf32>, vector<8x8xf32> -> vector<8x8xf32>
    %cst_13 = arith.constant 2.000000e+00 : f32
    %30 = vector.broadcast %cst_13 : f32 to vector<8x8xf32>
    %31 = arith.mulf %29, %30 : vector<8x8xf32>
    %cst_14 = arith.constant dense<0xFF800000> : vector<8xf32>
    %32 = vector.multi_reduction <maximumf>, %31, %cst_14 [1] : vector<8x8xf32> to vector<8xf32>
    %33 = vector.shape_cast %32 : vector<8xf32> to vector<8x1xf32>
    %34 = arith.maximumf %18, %33 : vector<8x1xf32>
    %35 = arith.subf %18, %34 : vector<8x1xf32>
    %36 = math.exp %35 : vector<8x1xf32>
    %37 = arith.mulf %27, %36 : vector<8x1xf32>
    %38 = vector.broadcast %34 : vector<8x1xf32> to vector<8x8xf32>
    %39 = arith.subf %31, %38 : vector<8x8xf32>
    %40 = math.exp %39 : vector<8x8xf32>
    %c0_15 = arith.constant 0 : index
    %c0_16 = arith.constant 0 : index
    %41 = vector.load %arg3[%c0_15, %c0_16] : memref<8x24xf32, #tpu.memory_space<vmem>>, vector<8x8xf32>
    %42 = arith.mulf %40, %41 : vector<8x8xf32>
    %cst_17 = arith.constant dense<0.000000e+00> : vector<8xf32>
    %43 = vector.multi_reduction <add>, %42, %cst_17 [1] : vector<8x8xf32> to vector<8xf32>
    %44 = vector.shape_cast %43 : vector<8xf32> to vector<8x1xf32>
    %45 = arith.addf %37, %44 : vector<8x1xf32>
    %c0_18 = arith.constant 0 : index
    %c24 = arith.constant 24 : index
    %46 = vector.load %arg2[%c0_18, %c24] : memref<128x40xf32, #tpu.memory_space<vmem>>, vector<128x8xf32>
    %cst_19 = arith.constant dense<0.000000e+00> : vector<8x8xf32>
    %47 = tpu.matmul %0, %46, %cst_19 {dimension_numbers = #tpu.dot_dimension_numbers<[1], [0], [0], [1], [0, 0, 1, 1], [], []>} : vector<8x128xf32>, vector<128x8xf32>, vector<8x8xf32> -> vector<8x8xf32>
    %cst_20 = arith.constant 2.000000e+00 : f32
    %48 = vector.broadcast %cst_20 : f32 to vector<8x8xf32>
    %49 = arith.mulf %47, %48 : vector<8x8xf32>
    %cst_21 = arith.constant dense<0xFF800000> : vector<8xf32>
    %50 = vector.multi_reduction <maximumf>, %49, %cst_21 [1] : vector<8x8xf32> to vector<8xf32>
    %51 = vector.shape_cast %50 : vector<8xf32> to vector<8x1xf32>
    %52 = arith.maximumf %34, %51 : vector<8x1xf32>
    %53 = arith.subf %34, %52 : vector<8x1xf32>
    %54 = math.exp %53 : vector<8x1xf32>
    %55 = arith.mulf %45, %54 : vector<8x1xf32>
    %56 = vector.broadcast %52 : vector<8x1xf32> to vector<8x8xf32>
    %57 = arith.subf %49, %56 : vector<8x8xf32>
    %58 = math.exp %57 : vector<8x8xf32>
    %c0_22 = arith.constant 0 : index
    %c8_23 = arith.constant 8 : index
    %59 = vector.load %arg3[%c0_22, %c8_23] : memref<8x24xf32, #tpu.memory_space<vmem>>, vector<8x8xf32>
    %60 = arith.mulf %58, %59 : vector<8x8xf32>
    %cst_24 = arith.constant dense<0.000000e+00> : vector<8xf32>
    %61 = vector.multi_reduction <add>, %60, %cst_24 [1] : vector<8x8xf32> to vector<8xf32>
    %62 = vector.shape_cast %61 : vector<8xf32> to vector<8x1xf32>
    %63 = arith.addf %55, %62 : vector<8x1xf32>
    %c0_25 = arith.constant 0 : index
    %c32 = arith.constant 32 : index
    %64 = vector.load %arg2[%c0_25, %c32] : memref<128x40xf32, #tpu.memory_space<vmem>>, vector<128x8xf32>
    %cst_26 = arith.constant dense<0.000000e+00> : vector<8x8xf32>
    %65 = tpu.matmul %0, %64, %cst_26 {dimension_numbers = #tpu.dot_dimension_numbers<[1], [0], [0], [1], [0, 0, 1, 1], [], []>} : vector<8x128xf32>, vector<128x8xf32>, vector<8x8xf32> -> vector<8x8xf32>
    %cst_27 = arith.constant 2.000000e+00 : f32
    %66 = vector.broadcast %cst_27 : f32 to vector<8x8xf32>
    %67 = arith.mulf %65, %66 : vector<8x8xf32>
    %cst_28 = arith.constant dense<0xFF800000> : vector<8xf32>
    %68 = vector.multi_reduction <maximumf>, %67, %cst_28 [1] : vector<8x8xf32> to vector<8xf32>
    %69 = vector.shape_cast %68 : vector<8xf32> to vector<8x1xf32>
    %70 = arith.maximumf %52, %69 : vector<8x1xf32>
    %71 = arith.subf %52, %70 : vector<8x1xf32>
    %72 = math.exp %71 : vector<8x1xf32>
    %73 = arith.mulf %63, %72 : vector<8x1xf32>
    %74 = vector.broadcast %70 : vector<8x1xf32> to vector<8x8xf32>
    %75 = arith.subf %67, %74 : vector<8x8xf32>
    %76 = math.exp %75 : vector<8x8xf32>
    %c0_29 = arith.constant 0 : index
    %c16_30 = arith.constant 16 : index
    %77 = vector.load %arg3[%c0_29, %c16_30] : memref<8x24xf32, #tpu.memory_space<vmem>>, vector<8x8xf32>
    %78 = arith.mulf %76, %77 : vector<8x8xf32>
    %cst_31 = arith.constant dense<0.000000e+00> : vector<8xf32>
    %79 = vector.multi_reduction <add>, %78, %cst_31 [1] : vector<8x8xf32> to vector<8xf32>
    %80 = vector.shape_cast %79 : vector<8xf32> to vector<8x1xf32>
    %81 = arith.addf %73, %80 : vector<8x1xf32>
    %cst_32 = arith.constant 0.000000e+00 : f32
    %82 = vector.broadcast %cst_32 : f32 to vector<8x1xf32>
    %c0_33 = arith.constant 0 : index
    %c0_34 = arith.constant 0 : index
    %c0_35 = arith.constant 0 : index
    %83 = vector.load %arg4[%c0_33, %c0_34, %c0_35] : memref<8x4x128xf32, #tpu.memory_space<vmem>>, vector<8x1x128xf32>
    %84 = vector.shape_cast %83 : vector<8x1x128xf32> to vector<8x128xf32>
    %85 = arith.mulf %0, %84 : vector<8x128xf32>
    %cst_36 = arith.constant dense<0.000000e+00> : vector<8xf32>
    %86 = vector.multi_reduction <add>, %85, %cst_36 [1] : vector<8x128xf32> to vector<8xf32>
    %87 = vector.shape_cast %86 : vector<8xf32> to vector<8x1xf32>
    %cst_37 = arith.constant 2.000000e+00 : f32
    %88 = vector.broadcast %cst_37 : f32 to vector<8x1xf32>
    %89 = arith.mulf %87, %88 : vector<8x1xf32>
    %c0_38 = arith.constant 0 : index
    %c0_39 = arith.constant 0 : index
    %90 = vector.load %arg5[%c0_38, %c0_39] : memref<8x4xf32, #tpu.memory_space<vmem>>, vector<8x1xf32>
    %91 = arith.subf %89, %70 : vector<8x1xf32>
    %92 = math.exp %91 : vector<8x1xf32>
    %93 = arith.mulf %90, %92 : vector<8x1xf32>
    %94 = arith.addf %82, %93 : vector<8x1xf32>
    %c0_40 = arith.constant 0 : index
    %c1 = arith.constant 1 : index
    %c0_41 = arith.constant 0 : index
    %95 = vector.load %arg4[%c0_40, %c1, %c0_41] : memref<8x4x128xf32, #tpu.memory_space<vmem>>, vector<8x1x128xf32>
    %96 = vector.shape_cast %95 : vector<8x1x128xf32> to vector<8x128xf32>
    %97 = arith.mulf %0, %96 : vector<8x128xf32>
    %cst_42 = arith.constant dense<0.000000e+00> : vector<8xf32>
    %98 = vector.multi_reduction <add>, %97, %cst_42 [1] : vector<8x128xf32> to vector<8xf32>
    %99 = vector.shape_cast %98 : vector<8xf32> to vector<8x1xf32>
    %cst_43 = arith.constant 2.000000e+00 : f32
    %100 = vector.broadcast %cst_43 : f32 to vector<8x1xf32>
    %101 = arith.mulf %99, %100 : vector<8x1xf32>
    %c0_44 = arith.constant 0 : index
    %c1_45 = arith.constant 1 : index
    %102 = vector.load %arg5[%c0_44, %c1_45] : memref<8x4xf32, #tpu.memory_space<vmem>>, vector<8x1xf32>
    %103 = arith.subf %101, %70 : vector<8x1xf32>
    %104 = math.exp %103 : vector<8x1xf32>
    %105 = arith.mulf %102, %104 : vector<8x1xf32>
    %106 = arith.addf %94, %105 : vector<8x1xf32>
    %c0_46 = arith.constant 0 : index
    %c2 = arith.constant 2 : index
    %c0_47 = arith.constant 0 : index
    %107 = vector.load %arg4[%c0_46, %c2, %c0_47] : memref<8x4x128xf32, #tpu.memory_space<vmem>>, vector<8x1x128xf32>
    %108 = vector.shape_cast %107 : vector<8x1x128xf32> to vector<8x128xf32>
    %109 = arith.mulf %0, %108 : vector<8x128xf32>
    %cst_48 = arith.constant dense<0.000000e+00> : vector<8xf32>
    %110 = vector.multi_reduction <add>, %109, %cst_48 [1] : vector<8x128xf32> to vector<8xf32>
    %111 = vector.shape_cast %110 : vector<8xf32> to vector<8x1xf32>
    %cst_49 = arith.constant 2.000000e+00 : f32
    %112 = vector.broadcast %cst_49 : f32 to vector<8x1xf32>
    %113 = arith.mulf %111, %112 : vector<8x1xf32>
    %c0_50 = arith.constant 0 : index
    %c2_51 = arith.constant 2 : index
    %114 = vector.load %arg5[%c0_50, %c2_51] : memref<8x4xf32, #tpu.memory_space<vmem>>, vector<8x1xf32>
    %115 = arith.subf %113, %70 : vector<8x1xf32>
    %116 = math.exp %115 : vector<8x1xf32>
    %117 = arith.mulf %114, %116 : vector<8x1xf32>
    %118 = arith.addf %106, %117 : vector<8x1xf32>
    %c0_52 = arith.constant 0 : index
    %c3 = arith.constant 3 : index
    %c0_53 = arith.constant 0 : index
    %119 = vector.load %arg4[%c0_52, %c3, %c0_53] : memref<8x4x128xf32, #tpu.memory_space<vmem>>, vector<8x1x128xf32>
    %120 = vector.shape_cast %119 : vector<8x1x128xf32> to vector<8x128xf32>
    %121 = arith.mulf %0, %120 : vector<8x128xf32>
    %cst_54 = arith.constant dense<0.000000e+00> : vector<8xf32>
    %122 = vector.multi_reduction <add>, %121, %cst_54 [1] : vector<8x128xf32> to vector<8xf32>
    %123 = vector.shape_cast %122 : vector<8xf32> to vector<8x1xf32>
    %cst_55 = arith.constant 2.000000e+00 : f32
    %124 = vector.broadcast %cst_55 : f32 to vector<8x1xf32>
    %125 = arith.mulf %123, %124 : vector<8x1xf32>
    %c0_56 = arith.constant 0 : index
    %c3_57 = arith.constant 3 : index
    %126 = vector.load %arg5[%c0_56, %c3_57] : memref<8x4xf32, #tpu.memory_space<vmem>>, vector<8x1xf32>
    %127 = arith.subf %125, %70 : vector<8x1xf32>
    %128 = math.exp %127 : vector<8x1xf32>
    %129 = arith.mulf %126, %128 : vector<8x1xf32>
    %130 = arith.addf %118, %129 : vector<8x1xf32>
    %131 = arith.subf %81, %130 : vector<8x1xf32>
    %132 = math.log %131 : vector<8x1xf32>
    %133 = math.log %130 : vector<8x1xf32>
    %134 = arith.subf %132, %133 : vector<8x1xf32>
    %135 = tpu.iota {dimensions = array<i32: 0>} : vector<8x8xi32>
    %136 = tpu.iota {dimensions = array<i32: 1>} : vector<8x8xi32>
    %137 = arith.cmpi eq, %135, %136 : vector<8x8xi32>
    %cst_58 = arith.constant 0.000000e+00 : f32
    %138 = vector.shape_cast %134 : vector<8x1xf32> to vector<8x1xf32>
    %139 = vector.broadcast %138 : vector<8x1xf32> to vector<8x8xf32>
    %140 = vector.broadcast %cst_58 : f32 to vector<8x8xf32>
    %141 = arith.select %137, %139, %140 : vector<8x8xi1>, vector<8x8xf32>
    %cst_59 = arith.constant dense<0.000000e+00> : vector<8xf32>
    %142 = vector.multi_reduction <add>, %141, %cst_59 [0] : vector<8x8xf32> to vector<8xf32>
    %143 = vector.shape_cast %142 : vector<8xf32> to vector<1x8xf32>
    %c0_60 = arith.constant 0 : index
    %c0_61 = arith.constant 0 : index
    %c0_62 = arith.constant 0 : index
    %144 = vector.load %arg6[%c0_60, %c0_61, %c0_62] : memref<1x1x8xf32, #tpu.memory_space<vmem>>, vector<1x1x8xf32>
    %145 = vector.shape_cast %144 : vector<1x1x8xf32> to vector<1x8xf32>
    %146 = vector.shape_cast %143 : vector<1x8xf32> to vector<1x1x8xf32>
    tpu.vector_store %arg6[%c0_60, %c0_61, %c0_62], %146 {strides = array<i32>} : memref<1x1x8xf32, #tpu.memory_space<vmem>>, vector<1x1x8xf32>,
    return
  }
  func.func @transform_0(%arg0: i32) -> (i32, i32) {
    %c0_i32 = arith.constant 0 : i32
    %c0_i32_0 = arith.constant 0 : i32
    return %arg0, %c0_i32 : i32, i32
  }
  func.func @transform_1(%arg0: i32) -> (i32, i32) {
    %c0_i32 = arith.constant 0 : i32
    %c0_i32_0 = arith.constant 0 : i32
    %c0_i32_1 = arith.constant 0 : i32
    return %c0_i32, %c0_i32_0 : i32, i32
  }
  func.func @transform_2(%arg0: i32) -> (i32, i32) {
    %c0_i32 = arith.constant 0 : i32
    %c0_i32_0 = arith.constant 0 : i32
    return %arg0, %c0_i32 : i32, i32
  }
  func.func @transform_3(%arg0: i32) -> (i32, i32, i32) {
    %c0_i32 = arith.constant 0 : i32
    %c0_i32_0 = arith.constant 0 : i32
    %c0_i32_1 = arith.constant 0 : i32
    return %arg0, %c0_i32, %c0_i32_0 : i32, i32, i32
  }
  func.func @transform_4(%arg0: i32) -> (i32, i32) {
    %c0_i32 = arith.constant 0 : i32
    %c0_i32_0 = arith.constant 0 : i32
    return %arg0, %c0_i32 : i32, i32
  }
  func.func @transform_5(%arg0: i32) -> (i32, i32, i32) {
    %c0_i32 = arith.constant 0 : i32
    %c0_i32_0 = arith.constant 0 : i32
    %c0_i32_1 = arith.constant 0 : i32
    return %arg0, %c0_i32, %c0_i32_0 : i32, i32, i32
  }
}

</mosaic_0001>

<bundles_post_ra>
// kernel: tpu_custom_call.1
= control target key start
LH: loop header
LB: loop body
LE: loop exit
PB: predicated region body
PF: predicated region fallthrough
CT: control target
= control target key end

     0   :  { %v1510_v3 = vmov 0.0|0.0   ;;  %s1511_s30 = smov 120   ;;  %s1512_s6 = smov 112   ;;  %vm1513_vm0 = vmmov 0   ;;  %v1514_v14 = vmov 0.0   ;;  %s1913_s0 = inlined_call_operand.vmem [shape: f32[8,128], index: 0, kind: input, shape index: {}]   ;;  %s1914_s1 = inlined_call_operand.vmem [shape: f32[128,40], index: 1, kind: input, shape index: {}]   ;;  %s1915_s2 = inlined_call_operand.vmem [shape: f32[8,24], index: 2, kind: input, shape index: {}]   ;;  %s1916_s3 = inlined_call_operand.vmem [shape: f32[8,4,128], index: 3, kind: input, shape index: {}]   ;;  %s1917_s4 = inlined_call_operand.vmem [shape: f32[8,4], index: 4, kind: input, shape index: {}]   ;;  %s1918_s5 = inlined_call_operand.hbm [shape: f32[1,1,8], index: 5, kind: output, shape index: {}]  }
   0x1   :  { %v22_v0 = vld [vmem:[%s1914_s1] sm:$0xff]  ;;  %v23_v1 = vld [vmem:[%s1914_s1 + $0x8] sm:$0xff]  ;;  %v24_v2 = vld [vmem:[%s1914_s1 + $0x10] sm:$0xff]  ;;  %1162 = vmatprep.subr.bf16.mxu0 %v1510_v3  ;;  %1186 = vmatprep.subr.bf16.mxu1 %v1510_v3 }
   0x2   :  { %v1562_v4 = vpack.i.bf16 %v23_v1, %v22_v0  ;;  %v1163_v5 = vpack.c.bf16 %v23_v1, %v22_v0  ;;  %v25_v6 = vld [vmem:[%s1914_s1 + $0x18] sm:$0xff]  ;;  %v26_v7 = vld [vmem:[%s1914_s1 + $0x20] sm:$0xff]  ;;  %v27_v8 = vld [vmem:[%s1914_s1 + $0x28] sm:$0xff]  ;;  %1019 = vmatprep.mubr.msk.f32.mxu0 %vm1513_vm0, %v1514_v14 }
   0x3   :  { %v1576_v9 = vpack.i.bf16 %v25_v6, %v24_v2  ;;  %v1166_v10 = vpack.c.bf16 %v25_v6, %v24_v2  ;;  %v1581_v11 = vpack.i.bf16 %v27_v8, %v26_v7  ;;  %v28_v12 = vld [vmem:[%s1914_s1 + $0x30] sm:$0xff]  ;;  %v29_v13 = vld [vmem:[%s1914_s1 + $0x38] sm:$0xff] }
   0x4   :  { %1295 = vrot.lane.b32.xlu0 %v1562_v4, %s1511_s30  ;;  %1164 = vmatpush3.bf16.msra.mxu0 %v1163_v5 }
   0x5   :  { %1165 = vmatprep.subr.bf16.mxu0 %v1510_v3  ;;  %1305 = vrot.lane.b32.xlu1 %v1562_v4, %s1512_s6 }
   0x6   :  { %10 = vsyncpa [#allocation3], 0  ;;  %1054 = vmatprep.mubr.msk.f32.mxu1 %vm1513_vm0, %v1514_v14  ;;  %v1169_v15 = vpack.c.bf16 %v27_v8, %v26_v7  ;;  %v1319_v16 = vpack.i.bf16 %v29_v13, %v28_v12  ;;  %v30_v17 = vld [vmem:[%s1914_s1 + $0x40] sm:$0xff]  ;;  %v31_v18 = vld [vmem:[%s1914_s1 + $0x48] sm:$0xff]  ;;  %v1172_v19 = vpack.c.bf16 %v29_v13, %v28_v12  ;;  %s1515_s28 = smov 104   ;;  %s1516_s29 = smov 96  }
   0x7   :  { %v1329_v20 = vpack.i.bf16 %v31_v18, %v30_v17  ;;  %v32_v21 = vld [vmem:[%s1914_s1 + $0x50] sm:$0xff]  ;;  %v33_v22 = vld [vmem:[%s1914_s1 + $0x58] sm:$0xff]  ;;  %v1175_v23 = vpack.c.bf16 %v31_v18, %v30_v17  ;;  %v34_v25 = vld [vmem:[%s1914_s1 + $0x60] sm:$0xff]  ;;  %vm699_vm1 = vcmask 1041409   ;;  %vm702_vm2 = vcmask 1042434   ;;  %s1517_s20 = smov 127  }
   0x8   :  { %1300 = vrot.lane.b32.xlu0 %v1576_v9, %s1511_s30  ;;  %1167 = vmatpush3.bf16.msra.mxu0 %v1166_v10  ;;  %v1339_v24 = vpack.i.bf16 %v33_v22, %v32_v21  ;;  %v35_v26 = vld [vmem:[%s1914_s1 + $0x68] sm:$0xff]  ;;  %v1178_v27 = vpack.c.bf16 %v33_v22, %v32_v21  ;;  %v36_v29 = vld [vmem:[%s1914_s1 + $0x70] sm:$0xff]  ;;  %v37_v30 = vld [vmem:[%s1914_s1 + $0x78] sm:$0xff]  ;;  %vm705_vm3 = vcmask 1043459   ;;  %vm708_vm4 = vcmask 1044484   ;;  %s1518_s21 = smov 125  }
   0x9   :  { %1168 = vmatprep.subr.bf16.mxu0 %v1510_v3  ;;  %1310 = vrot.lane.b32.xlu1 %v1581_v11, %s1511_s30  ;;  %v1349_v28 = vpack.i.bf16 %v35_v26, %v34_v25  ;;  %v1181_v31 = vpack.c.bf16 %v35_v26, %v34_v25  ;;  %v1359_v32 = vpack.i.bf16 %v37_v30, %v36_v29  ;;  %v1643_v34 = vld [vmem:[%s1913_s0] sm:$0xff]  ;;  %v732_v36 = vld [vmem:[%s1916_s3 + $0x9] sm:$0x1]  ;;  %v733_v39 = vld [vmem:[%s1916_s3 + $0xd] sm:$0x1]  ;;  %vm711_vm5 = vcmask 1045509  }
   0xa   :  { %v1184_v33 = vpack.c.bf16 %v37_v30, %v36_v29  ;;  %v731_v35 = vld [vmem:[%s1916_s3 + $0x5] sm:$0x1]  ;;  %v730_v38 = vld [vmem:[%s1916_s3 + $0x1] sm:$0x1]  ;;  %v748_v40 = vrot.slane %v732_v36, 6  ;;  %v750_v43 = vrot.slane %v733_v39, 5 }
   0xb   :  { %v746_v37 = vrot.slane %v731_v35, 7  ;;  %v734_v42 = vld [vmem:[%s1916_s3 + $0x11] sm:$0x1]  ;;  %v735_v45 = vld [vmem:[%s1916_s3 + $0x15] sm:$0x1]  ;;  %vm714_vm6 = vcmask 1046534  }
   0xc   :  { %1315 = vrot.lane.b32.xlu0 %v1576_v9, %s1512_s6  ;;  %1170 = vmatpush3.bf16.msra.mxu0 %v1169_v15  ;;  %v752_v46 = vrot.slane %v734_v42, 4  ;;  %v736_v48 = vld [vmem:[%s1916_s3 + $0x19] sm:$0x1]  ;;  %v754_v49 = vrot.slane %v735_v45, 3  ;;  %v737_v51 = vld [vmem:[%s1916_s3 + $0x1d] sm:$0x1] }
   0xd   :  { %1171 = vmatprep.subr.bf16.mxu0 %v1510_v3  ;;  %1320 = vrot.lane.b32.xlu1 %v1319_v16, %s1511_s30  ;;  %v747_v41 = vsel %vm699_vm1, %v746_v37, %v730_v38  ;;  %v756_v52 = vrot.slane %v736_v48, 2  ;;  %v758_v54 = vrot.slane %v737_v51, 1  ;;  %vm717_vm7 = vcmask 1047559   ;;  %v775_v5 = vld [vmem:[%s1916_s3 + $0x6] sm:$0x1]  ;;  %s1519_s22 = smov 126  }
   0xe   :  { %v749_v44 = vsel %vm702_vm2, %v748_v40, %v747_v41  ;;  %v776_v6 = vld [vmem:[%s1916_s3 + $0xa] sm:$0x1]  ;;  %v777_v10 = vld [vmem:[%s1916_s3 + $0xe] sm:$0x1]  ;;  %v779_v12 = vld [vmem:[%s1916_s3 + $0x16] sm:$0x1] }
   0xf   :  { %v751_v47 = vsel %vm705_vm3, %v750_v43, %v749_v44  ;;  %v790_v17 = vrot.slane %v775_v5, 7  ;;  %v792_v18 = vrot.slane %v776_v6, 6  ;;  %v794_v21 = vrot.slane %v777_v10, 5 }
  0x10   :  { %1325 = vrot.lane.b32.xlu0 %v1581_v11, %s1512_s6  ;;  %1173 = vmatpush3.bf16.msra.mxu0 %v1172_v19  ;;  %v753_v50 = vsel %vm708_vm4, %v752_v46, %v751_v47  ;;  %v798_v26 = vrot.slane %v779_v12, 3  ;;  %vm109_vm8 = vcmask 64512   ;;  %vm886_vm10 = vcmask 57344  }
  0x11   :  { %1174 = vmatprep.subr.bf16.mxu0 %v1510_v3  ;;  %1330 = vrot.lane.b32.xlu1 %v1329_v20, %s1511_s30  ;;  %v755_v53 = vsel %vm711_vm5, %v754_v49, %v753_v50 }
  0x12   :  { %v757_v55 = vsel %vm714_vm6, %v756_v52, %v755_v53 }
  0x13   :  { %v759_v56 = vsel %vm717_vm7, %v758_v54, %v757_v55 }
  0x14   :  { %1335 = vrot.lane.b32.xlu0 %v1319_v16, %s1512_s6  ;;  %1176 = vmatpush3.bf16.msra.mxu0 %v1175_v23  ;;  %v761_v57 = vmul.f32 %v759_v56, %v1643_v34 }
  0x15   :  { %1177 = vmatprep.subr.bf16.mxu0 %v1510_v3  ;;  %1340 = vrot.lane.b32.xlu1 %v1339_v24, %s1511_s30 }
  0x18   :  { %1345 = vrot.lane.b32.xlu0 %v1329_v20, %s1512_s6  ;;  %1179 = vmatpush3.bf16.msra.mxu0 %v1178_v27 }
  0x19   :  { %1180 = vmatprep.subr.bf16.mxu0 %v1510_v3  ;;  %1350 = vrot.lane.b32.xlu1 %v1349_v28, %s1511_s30 }
  0x1c   :  { %1355 = vrot.lane.b32.xlu0 %v1339_v24, %s1512_s6  ;;  %1182 = vmatpush3.bf16.msra.mxu0 %v1181_v31 }
  0x1d   :  { %1183 = vmatprep.subr.bf16.mxu0 %v1510_v3  ;;  %1360 = vrot.lane.b32.xlu1 %v1359_v32, %s1511_s30 }
  0x20   :  { %1365 = vrot.lane.b32.xlu0 %v1349_v28, %s1512_s6  ;;  %1185 = vmatpush3.bf16.msra.mxu0 %v1184_v33 }
  0x21   :  { %1370 = vrot.lane.b32.xlu1 %v1359_v32, %s1512_s6  ;;  %1210 = vmatprep.subr.bf16.mxu0 %v1510_v3 }
  0x23   :  { %1020 = vmatmul.mubr.f32.vlgmr.msra.gmra.mrb[0].mxu0 %v1643_v34 }
  0x24   :  { %1375 = vrot.lane.b32.xlu0 %v1562_v4, %s1515_s28  ;;  %1089 = vmatprep.mubr.msk.f32.mxu0 %vm1513_vm0, %v1514_v14 }
  0x25   :  { %1380 = vrot.lane.b32.xlu1 %v1576_v9, %s1515_s28 }
  0x28   :  { %1385 = vrot.lane.b32.xlu0 %v1562_v4, %s1516_s29  ;;  %v774_v4 = vld [vmem:[%s1916_s3 + $0x2] sm:$0x1] }
  0x29   :  { %1390 = vrot.lane.b32.xlu1 %v1581_v11, %s1515_s28  ;;  %v791_v25 = vsel %vm699_vm1, %v790_v17, %v774_v4 }
  0x2a   :  { %v793_v30 = vsel %vm702_vm2, %v792_v18, %v791_v25 }
  0x2b   :  { %v795_v35 = vsel %vm705_vm3, %v794_v21, %v793_v30 }
  0x2c   :  { %1395 = vrot.lane.b32.xlu0 %v1576_v9, %s1516_s29 }
  0x2d   :  { %1400 = vrot.lane.b32.xlu1 %v1319_v16, %s1515_s28 }
  0x30   :  { %1405 = vrot.lane.b32.xlu0 %v1581_v11, %s1516_s29  ;;  %v778_v11 = vld [vmem:[%s1916_s3 + $0x12] sm:$0x1] }
  0x31   :  { %1410 = vrot.lane.b32.xlu1 %v1329_v20, %s1515_s28  ;;  %v796_v22 = vrot.slane %v778_v11, 4 }
  0x33   :  { %v797_v38 = vsel %vm708_vm4, %v796_v22, %v795_v35 }
  0x34   :  { %1415 = vrot.lane.b32.xlu0 %v1319_v16, %s1516_s29  ;;  %v780_v16 = vld [vmem:[%s1916_s3 + $0x1a] sm:$0x1]  ;;  %v799_v40 = vsel %vm711_vm5, %v798_v26, %v797_v38 }
  0x35   :  { %1420 = vrot.lane.b32.xlu1 %v1339_v24, %s1515_s28  ;;  %v800_v31 = vrot.slane %v780_v16, 2 }
  0x37   :  { %v801_v45 = vsel %vm714_vm6, %v800_v31, %v799_v40 }
  0x38   :  { %1425 = vrot.lane.b32.xlu0 %v1329_v20, %s1516_s29  ;;  %v781_v20 = vld [vmem:[%s1916_s3 + $0x1e] sm:$0x1] }
  0x39   :  { %1430 = vrot.lane.b32.xlu1 %v1349_v28, %s1515_s28  ;;  %v802_v36 = vrot.slane %v781_v20, 1 }
  0x3b   :  { %v803_v48 = vsel %vm717_vm7, %v802_v36, %v801_v45 }
  0x3c   :  { %1435 = vrot.lane.b32.xlu0 %v1339_v24, %s1516_s29  ;;  %v805_v50 = vmul.f32 %v803_v48, %v1643_v34 }
  0x3d   :  { %1440 = vrot.lane.b32.xlu1 %v1359_v32, %s1515_s28 }
  0x40   :  { %1445 = vrot.lane.b32.xlu0 %v1349_v28, %s1516_s29 }
  0x41   :  { %1450 = vrot.lane.b32.xlu1 %v1359_v32, %s1516_s29 }
  0x5f   :  { %762 = vadd.xlane.f32.xlu0 %v761_v57 }
  0x65   :  { %806 = vadd.xlane.f32.xlu1 %v805_v50 }
  0x76   :  { %v1296_v58 = vpop.permute.xlu0 %1295 }
  0x77   :  { %v1298_v59 = vunpack.i.h.bf16 %v1296_v58  ;;  %v1297_v60 = vunpack.i.l.bf16 %v1296_v58  ;;  %v1306_v61 = vpop.permute.xlu1 %1305 }
  0x78   :  { %v1308_v62 = vunpack.i.h.bf16 %v1306_v61  ;;  %v1307_v63 = vunpack.i.l.bf16 %v1306_v61 }
  0x79   :  { %v1187_v0 = vpack.c.bf16 %v1298_v59, %v1297_v60 }
  0x7a   :  { %v1211_v1 = vpack.c.bf16 %v1308_v62, %v1307_v63  ;;  %v1301_v2 = vpop.permute.xlu0 %1300 }
  0x7b   :  { %v1303_v7 = vunpack.i.h.bf16 %v1301_v2  ;;  %v1302_v8 = vunpack.i.l.bf16 %v1301_v2  ;;  %1188 = vmatpush3.bf16.msra.mxu1 %v1187_v0  ;;  %v1311_v9 = vpop.permute.xlu1 %1310 }
  0x7c   :  { %v1313_v13 = vunpack.i.h.bf16 %v1311_v9  ;;  %v1312_v15 = vunpack.i.l.bf16 %v1311_v9  ;;  %1189 = vmatprep.subr.bf16.mxu1 %v1510_v3  ;;  %1212 = vmatpush3.bf16.msra.mxu0 %v1211_v1 }
  0x7d   :  { %v1190_v19 = vpack.c.bf16 %v1303_v7, %v1302_v8  ;;  %1213 = vmatprep.subr.bf16.mxu0 %v1510_v3 }
  0x7e   :  { %v1193_v23 = vpack.c.bf16 %v1313_v13, %v1312_v15  ;;  %v1316_v24 = vpop.permute.xlu0 %1315 }
  0x7f   :  { %v1318_v27 = vunpack.i.h.bf16 %v1316_v24  ;;  %v1317_v28 = vunpack.i.l.bf16 %v1316_v24  ;;  %1191 = vmatpush3.bf16.msra.mxu1 %v1190_v19  ;;  %v1321_v29 = vpop.permute.xlu1 %1320 }
  0x80   :  { %v1323_v32 = vunpack.i.h.bf16 %v1321_v29  ;;  %v1322_v33 = vunpack.i.l.bf16 %v1321_v29  ;;  %1192 = vmatprep.subr.bf16.mxu1 %v1510_v3 }
  0x81   :  { %v1214_v37 = vpack.c.bf16 %v1318_v27, %v1317_v28 }
  0x82   :  { %v1326_v39 = vpop.permute.xlu0 %1325  ;;  %v1196_v41 = vpack.c.bf16 %v1323_v32, %v1322_v33 }
  0x83   :  { %v1328_v42 = vunpack.i.h.bf16 %v1326_v39  ;;  %v1327_v43 = vunpack.i.l.bf16 %v1326_v39  ;;  %1194 = vmatpush3.bf16.msra.mxu1 %v1193_v23  ;;  %1215 = vmatpush3.bf16.msra.mxu0 %v1214_v37  ;;  %v1331_v44 = vpop.permute.xlu1 %1330 }
  0x84   :  { %v1333_v46 = vunpack.i.h.bf16 %v1331_v44  ;;  %v1332_v47 = vunpack.i.l.bf16 %v1331_v44  ;;  %1195 = vmatprep.subr.bf16.mxu1 %v1510_v3  ;;  %1216 = vmatprep.subr.bf16.mxu0 %v1510_v3 }
  0x85   :  { %v1217_v49 = vpack.c.bf16 %v1328_v42, %v1327_v43 }
  0x86   :  { %v1336_v51 = vpop.permute.xlu0 %1335  ;;  %v1199_v52 = vpack.c.bf16 %v1333_v46, %v1332_v47 }
  0x87   :  { %v1338_v53 = vunpack.i.h.bf16 %v1336_v51  ;;  %v1337_v54 = vunpack.i.l.bf16 %v1336_v51  ;;  %1197 = vmatpush3.bf16.msra.mxu1 %v1196_v41  ;;  %1218 = vmatpush3.bf16.msra.mxu0 %v1217_v49  ;;  %v1341_v55 = vpop.permute.xlu1 %1340 }
  0x88   :  { %v1343_v56 = vunpack.i.h.bf16 %v1341_v55  ;;  %v1342_v57 = vunpack.i.l.bf16 %v1341_v55  ;;  %1198 = vmatprep.subr.bf16.mxu1 %v1510_v3  ;;  %1219 = vmatprep.subr.bf16.mxu0 %v1510_v3 }
  0x89   :  { %v1220_v58 = vpack.c.bf16 %v1338_v53, %v1337_v54 }
  0x8a   :  { %v1346_v59 = vpop.permute.xlu0 %1345  ;;  %v1202_v60 = vpack.c.bf16 %v1343_v56, %v1342_v57 }
  0x8b   :  { %v1348_v61 = vunpack.i.h.bf16 %v1346_v59  ;;  %v1347_v62 = vunpack.i.l.bf16 %v1346_v59  ;;  %1200 = vmatpush3.bf16.msra.mxu1 %v1199_v52  ;;  %1221 = vmatpush3.bf16.msra.mxu0 %v1220_v58  ;;  %v1351_v63 = vpop.permute.xlu1 %1350 }
  0x8c   :  { %v1353_v0 = vunpack.i.h.bf16 %v1351_v63  ;;  %v1352_v1 = vunpack.i.l.bf16 %v1351_v63  ;;  %1201 = vmatprep.subr.bf16.mxu1 %v1510_v3  ;;  %1222 = vmatprep.subr.bf16.mxu0 %v1510_v3 }
  0x8d   :  { %v1223_v2 = vpack.c.bf16 %v1348_v61, %v1347_v62 }
  0x8e   :  { %v1356_v4 = vpop.permute.xlu0 %1355  ;;  %v1205_v5 = vpack.c.bf16 %v1353_v0, %v1352_v1 }
  0x8f   :  { %v1358_v6 = vunpack.i.h.bf16 %v1356_v4  ;;  %v1357_v7 = vunpack.i.l.bf16 %v1356_v4  ;;  %1203 = vmatpush3.bf16.msra.mxu1 %v1202_v60  ;;  %1224 = vmatpush3.bf16.msra.mxu0 %v1223_v2  ;;  %v1361_v8 = vpop.permute.xlu1 %1360 }
  0x90   :  { %v1363_v9 = vunpack.i.h.bf16 %v1361_v8  ;;  %v1362_v10 = vunpack.i.l.bf16 %v1361_v8  ;;  %1204 = vmatprep.subr.bf16.mxu1 %v1510_v3  ;;  %1225 = vmatprep.subr.bf16.mxu0 %v1510_v3 }
  0x91   :  { %v1226_v11 = vpack.c.bf16 %v1358_v6, %v1357_v7 }
  0x92   :  { %v1366_v12 = vpop.permute.xlu0 %1365  ;;  %v1208_v13 = vpack.c.bf16 %v1363_v9, %v1362_v10 }
  0x93   :  { %v1368_v15 = vunpack.i.h.bf16 %v1366_v12  ;;  %v1367_v16 = vunpack.i.l.bf16 %v1366_v12  ;;  %1206 = vmatpush3.bf16.msra.mxu1 %v1205_v5  ;;  %1227 = vmatpush3.bf16.msra.mxu0 %v1226_v11  ;;  %v1371_v17 = vpop.permute.xlu1 %1370 }
  0x94   :  { %v1373_v18 = vunpack.i.h.bf16 %v1371_v17  ;;  %v1372_v19 = vunpack.i.l.bf16 %v1371_v17  ;;  %1207 = vmatprep.subr.bf16.mxu1 %v1510_v3  ;;  %1228 = vmatprep.subr.bf16.mxu0 %v1510_v3 }
  0x95   :  { %v1229_v20 = vpack.c.bf16 %v1368_v15, %v1367_v16 }
  0x96   :  { %v1376_v21 = vpop.permute.xlu0 %1375  ;;  %v1232_v22 = vpack.c.bf16 %v1373_v18, %v1372_v19 }
  0x97   :  { %v1378_v23 = vunpack.i.h.bf16 %v1376_v21  ;;  %v1377_v24 = vunpack.i.l.bf16 %v1376_v21  ;;  %1209 = vmatpush3.bf16.msra.mxu1 %v1208_v13  ;;  %1230 = vmatpush3.bf16.msra.mxu0 %v1229_v20  ;;  %v1381_v25 = vpop.permute.xlu1 %1380 }
  0x98   :  { %v1383_v26 = vunpack.i.h.bf16 %v1381_v25  ;;  %v1382_v27 = vunpack.i.l.bf16 %v1381_v25  ;;  %1231 = vmatprep.subr.bf16.mxu0 %v1510_v3  ;;  %1234 = vmatprep.subr.bf16.mxu1 %v1510_v3 }
  0x99   :  { %v1235_v28 = vpack.c.bf16 %v1378_v23, %v1377_v24 }
  0x9a   :  { %v1386_v29 = vpop.permute.xlu0 %1385  ;;  %1055 = vmatmul.mubr.f32.vlgmr.msra.gmra.mrb[0].mxu1 %v1643_v34  ;;  %v1238_v30 = vpack.c.bf16 %v1383_v26, %v1382_v27 }
  0x9b   :  { %v1388_v31 = vunpack.i.h.bf16 %v1386_v29  ;;  %v1387_v32 = vunpack.i.l.bf16 %v1386_v29  ;;  %1233 = vmatpush3.bf16.msra.mxu0 %v1232_v22  ;;  %1236 = vmatpush3.bf16.msra.mxu1 %v1235_v28  ;;  %v1391_v33 = vpop.permute.xlu1 %1390 }
  0x9c   :  { %v1393_v35 = vunpack.i.h.bf16 %v1391_v33  ;;  %v1392_v36 = vunpack.i.l.bf16 %v1391_v33  ;;  %1237 = vmatprep.subr.bf16.mxu1 %v1510_v3  ;;  %1258 = vmatprep.subr.bf16.mxu0 %v1510_v3 }
  0x9d   :  { %v1259_v37 = vpack.c.bf16 %v1388_v31, %v1387_v32  ;;  %1124 = vmatprep.mubr.msk.f32.mxu1 %vm1513_vm0, %v1514_v14 }
  0x9e   :  { %v1396_v38 = vpop.permute.xlu0 %1395  ;;  %1090 = vmatmul.mubr.f32.vlgmr.msra.gmra.mrb[2].mxu0 %v1643_v34  ;;  %v1241_v39 = vpack.c.bf16 %v1393_v35, %v1392_v36  ;;  %v819_v36 = vld [vmem:[%s1916_s3 + $0x7] sm:$0x1] }
  0x9f   :  { %v1398_v40 = vunpack.i.h.bf16 %v1396_v38  ;;  %v1397_v41 = vunpack.i.l.bf16 %v1396_v38  ;;  %1239 = vmatpush3.bf16.msra.mxu1 %v1238_v30  ;;  %1260 = vmatpush3.bf16.msra.mxu0 %v1259_v37  ;;  %v1401_v42 = vpop.permute.xlu1 %1400  ;;  %v820_v37 = vld [vmem:[%s1916_s3 + $0xb] sm:$0x1]  ;;  %v834_v38 = vrot.slane %v819_v36, 7 }
  0xa0   :  { %v1403_v43 = vunpack.i.h.bf16 %v1401_v42  ;;  %v1402_v44 = vunpack.i.l.bf16 %v1401_v42  ;;  %1240 = vmatprep.subr.bf16.mxu1 %v1510_v3  ;;  %1261 = vmatprep.subr.bf16.mxu0 %v1510_v3 }
  0xa1   :  { %v1262_v45 = vpack.c.bf16 %v1398_v40, %v1397_v41  ;;  %1159 = vmatprep.mubr.msk.f32.mxu0 %vm1513_vm0, %v1514_v14  ;;  %v821_v40 = vld [vmem:[%s1916_s3 + $0xf] sm:$0x1]  ;;  %v836_v41 = vrot.slane %v820_v37, 6 }
  0xa2   :  { %v1406_v46 = vpop.permute.xlu0 %1405  ;;  %v1244_v47 = vpack.c.bf16 %v1403_v43, %v1402_v44  ;;  %v822_v43 = vld [vmem:[%s1916_s3 + $0x13] sm:$0x1]  ;;  %v838_v44 = vrot.slane %v821_v40, 5 }
  0xa3   :  { %v1408_v48 = vunpack.i.h.bf16 %v1406_v46  ;;  %v1407_v49 = vunpack.i.l.bf16 %v1406_v46  ;;  %1242 = vmatpush3.bf16.msra.mxu1 %v1241_v39  ;;  %1263 = vmatpush3.bf16.msra.mxu0 %v1262_v45  ;;  %v1411_v50 = vpop.permute.xlu1 %1410  ;;  %v818_v39 = vld [vmem:[%s1916_s3 + $0x3] sm:$0x1]  ;;  %v823_v46 = vld [vmem:[%s1916_s3 + $0x17] sm:$0x1] }
  0xa4   :  { %v1413_v51 = vunpack.i.h.bf16 %v1411_v50  ;;  %v1412_v52 = vunpack.i.l.bf16 %v1411_v50  ;;  %1243 = vmatprep.subr.bf16.mxu1 %v1510_v3  ;;  %1264 = vmatprep.subr.bf16.mxu0 %v1510_v3  ;;  %v835_v42 = vsel %vm699_vm1, %v834_v38, %v818_v39  ;;  %v842_v50 = vrot.slane %v823_v46, 3 }
  0xa5   :  { %v1265_v53 = vpack.c.bf16 %v1408_v48, %v1407_v49  ;;  %v837_v45 = vsel %vm702_vm2, %v836_v41, %v835_v42  ;;  %v824_v49 = vld [vmem:[%s1916_s3 + $0x1b] sm:$0x1] }
  0xa6   :  { %v1416_v54 = vpop.permute.xlu0 %1415  ;;  %v1247_v55 = vpack.c.bf16 %v1413_v51, %v1412_v52  ;;  %v839_v48 = vsel %vm705_vm3, %v838_v44, %v837_v45  ;;  %v825_v52 = vld [vmem:[%s1916_s3 + $0x1f] sm:$0x1] }
  0xa7   :  { %v1418_v56 = vunpack.i.h.bf16 %v1416_v54  ;;  %v1417_v57 = vunpack.i.l.bf16 %v1416_v54  ;;  %1245 = vmatpush3.bf16.msra.mxu1 %v1244_v47  ;;  %1266 = vmatpush3.bf16.msra.mxu0 %v1265_v53  ;;  %v1421_v14 = vpop.permute.xlu1 %1420  ;;  %v840_v47 = vrot.slane %v822_v43, 4  ;;  %v844_v53 = vrot.slane %v824_v49, 2 }
  0xa8   :  { %v1423_v58 = vunpack.i.h.bf16 %v1421_v14  ;;  %v1422_v59 = vunpack.i.l.bf16 %v1421_v14  ;;  %1246 = vmatprep.subr.bf16.mxu1 %v1510_v3  ;;  %1267 = vmatprep.subr.bf16.mxu0 %v1510_v3 }
  0xa9   :  { %v1268_v60 = vpack.c.bf16 %v1418_v56, %v1417_v57  ;;  %v841_v51 = vsel %vm708_vm4, %v840_v47, %v839_v48 }
  0xaa   :  { %v1426_v61 = vpop.permute.xlu0 %1425  ;;  %v1250_v62 = vpack.c.bf16 %v1423_v58, %v1422_v59  ;;  %v843_v54 = vsel %vm711_vm5, %v842_v50, %v841_v51 }
  0xab   :  { %v1428_v63 = vunpack.i.h.bf16 %v1426_v61  ;;  %v1427_v0 = vunpack.i.l.bf16 %v1426_v61  ;;  %1248 = vmatpush3.bf16.msra.mxu1 %v1247_v55  ;;  %1269 = vmatpush3.bf16.msra.mxu0 %v1268_v60  ;;  %v1431_v1 = vpop.permute.xlu1 %1430  ;;  %v846_v55 = vrot.slane %v825_v52, 1  ;;  %v845_v56 = vsel %vm714_vm6, %v844_v53, %v843_v54 }
  0xac   :  { %v1433_v2 = vunpack.i.h.bf16 %v1431_v1  ;;  %v1432_v4 = vunpack.i.l.bf16 %v1431_v1  ;;  %1249 = vmatprep.subr.bf16.mxu1 %v1510_v3  ;;  %1270 = vmatprep.subr.bf16.mxu0 %v1510_v3 }
  0xad   :  { %v1271_v5 = vpack.c.bf16 %v1428_v63, %v1427_v0  ;;  %v847_v59 = vsel %vm717_vm7, %v846_v55, %v845_v56 }
  0xae   :  { %v1436_v6 = vpop.permute.xlu0 %1435  ;;  %v1253_v7 = vpack.c.bf16 %v1433_v2, %v1432_v4  ;;  %v399_v2 = vld [vmem:[%s1915_s2] sm:$0xff] }
  0xaf   :  { %v1438_v8 = vunpack.i.h.bf16 %v1436_v6  ;;  %v1437_v9 = vunpack.i.l.bf16 %v1436_v6  ;;  %1251 = vmatpush3.bf16.msra.mxu1 %v1250_v62  ;;  %1272 = vmatpush3.bf16.msra.mxu0 %v1271_v5  ;;  %v1441_v10 = vpop.permute.xlu1 %1440  ;;  %v849_v62 = vmul.f32 %v847_v59, %v1643_v34  ;;  %v683_v4 = vld [vmem:[%s1916_s3 + $0x4] sm:$0x1]  ;;  %v684_v6 = vld [vmem:[%s1916_s3 + $0x8] sm:$0x1] }
  0xb0   :  { %v1443_v11 = vunpack.i.h.bf16 %v1441_v10  ;;  %v1442_v12 = vunpack.i.l.bf16 %v1441_v10  ;;  %1252 = vmatprep.subr.bf16.mxu1 %v1510_v3  ;;  %1273 = vmatprep.subr.bf16.mxu0 %v1510_v3  ;;  %v701_v10 = vrot.slane %v684_v6, 6 }
  0xb1   :  { %v1274_v13 = vpack.c.bf16 %v1438_v8, %v1437_v9  ;;  %v682_v8 = vld [vmem:[%s1916_s3] sm:$0x1]  ;;  %v685_v9 = vld [vmem:[%s1916_s3 + $0xc] sm:$0x1] }
  0xb2   :  { %v1446_v15 = vpop.permute.xlu0 %1445  ;;  %v1256_v16 = vpack.c.bf16 %v1443_v11, %v1442_v12 }
  0xb3   :  { %v1448_v17 = vunpack.i.h.bf16 %v1446_v15  ;;  %v1447_v18 = vunpack.i.l.bf16 %v1446_v15  ;;  %1254 = vmatpush3.bf16.msra.mxu1 %v1253_v7  ;;  %1275 = vmatpush3.bf16.msra.mxu0 %v1274_v13  ;;  %v1451_v19 = vpop.permute.xlu1 %1450  ;;  %v698_v7 = vrot.slane %v683_v4, 7  ;;  %v686_v13 = vld [vmem:[%s1916_s3 + $0x10] sm:$0x1]  ;;  %v704_v15 = vrot.slane %v685_v9, 5 }
  0xb4   :  { %v1453_v20 = vunpack.i.h.bf16 %v1451_v19  ;;  %v1452_v21 = vunpack.i.l.bf16 %v1451_v19  ;;  %1255 = vmatprep.subr.bf16.mxu1 %v1510_v3  ;;  %1276 = vmatprep.subr.bf16.mxu0 %v1510_v3  ;;  %v707_v19 = vrot.slane %v686_v13, 4 }
  0xb5   :  { %v1277_v22 = vpack.c.bf16 %v1448_v17, %v1447_v18  ;;  %v700_v12 = vsel %vm699_vm1, %v698_v7, %v682_v8  ;;  %v687_v18 = vld [vmem:[%s1916_s3 + $0x14] sm:$0x1] }
  0xb6   :  { %v1280_v23 = vpack.c.bf16 %v1453_v20, %v1452_v21  ;;  %v703_v17 = vsel %vm702_vm2, %v701_v10, %v700_v12 }
  0xb7   :  { %1257 = vmatpush3.bf16.msra.mxu1 %v1256_v16  ;;  %1278 = vmatpush3.bf16.msra.mxu0 %v1277_v22  ;;  %v706_v20 = vsel %vm705_vm3, %v704_v15, %v703_v17  ;;  %v688_v22 = vld [vmem:[%s1916_s3 + $0x18] sm:$0x1]  ;;  %v724_v15 = vld [vmem:[%s1917_s4] sm:$0xff]  ;;  %s1521_s4 = smov [#allocation2]  }
  0xb8   :  { %1279 = vmatprep.subr.bf16.mxu0 %v1510_v3  ;;  %s894_s23 = sshll.u32 %s1521_s4, 4  ;;  %s895_s23 = int_to_ptr.vmem [resolvable:$true] %s894_s23 }
  0xb9   :  { %s1486_s24 = scalar_lea.vmem %s895_s23, 16  ;;  %s1490_s25 = scalar_lea.vmem %s895_s23, 32 }
  0xba   :  { %1125 = vmatmul.mubr.f32.vlgmr.msra.gmra.mrb[2].mxu1 %v1643_v34  ;;  %p1487_p0 = scmp.ne.s32.totalorder %s895_s23, %s1486_s24  ;;  %p1491_p1 = scmp.lt.s32.totalorder %s895_s23, %s895_s23 }
  0xbb   :  { %1281 = vmatpush3.bf16.msra.mxu0 %v1280_v23  ;;  %v710_v23 = vrot.slane %v687_v18, 3  ;;  %p1492_p2 = scmp.lt.s32.totalorder %s1490_s25, %s1486_s24 }
  0xbd   :  { %p1493_p3 = por %p1492_p2, %p1491_p1 }
  0xbe   :  { %1160 = vmatmul.mubr.f32.vlgmr.msra.gmra.mrb[4].mxu0 %v1643_v34 }
  0xbf   :  { %p1494_p4 = pnand %p1493_p3, %p1487_p0 }
  0xec   :  { %v1817_v5 = vpop.xlane.xlu0 %762 }
  0xed   :  { %v764_v59 = vmul.f32 2.0, %v1817_v5 }
  0xf2   :  { %v807_v36 = vpop.xlane.xlu1 %806 }
  0xf3   :  { %v808_v7 = vmul.f32 2.0, %v807_v36 }
  0xf6   :  { %v104_v24 = vpop.f32.mrb[0].mxu0 }
  0xf7   :  { %v1758_v25 = vmul.f32 2.0, %v104_v24  ;;  %v1021_v26 = vpop.f32.mrb[1].mxu0  ;;  %v709_v24 = vsel %vm708_vm4, %v707_v19, %v706_v20 }
  0xf8   :  { %v713_v26 = vrot.slane %v688_v22, 2 }
  0xf9   :  { %v110_v27 = vsel %vm109_vm8, %v1758_v25, -inf }
  0xfa   :  { %111 = vmax.xlane.f32.xlu0 %v110_v27  ;;  %v712_v27 = vsel %vm711_vm5, %v710_v23, %v709_v24  ;;  %v1520_v24 = vmov 0  }
  0xfb   :  { %1454 = vset.pattern.permute.xlu1 %v1520_v24  ;;  %1455 = vset.pattern.permute.xlu0 %v1520_v24 }
 0x16d   :  { %v249_v28 = vpop.f32.mrb[0].mxu1 }
 0x16e   :  { %v1762_v29 = vmul.f32 2.0, %v249_v28  ;;  %v1056_v30 = vpop.f32.mrb[1].mxu1 }
 0x16f   :  { %v715_v30 = vsel %vm714_vm6, %v713_v26, %v712_v27 }
 0x170   :  { %v254_v3 = vsel %vm109_vm8, %v1762_v29, -inf }
 0x171   :  { %255 = vmax.xlane.f32.xlu1 %v254_v3  ;;  %v383_v31 = vpop.f32.mrb[2].mxu0 }
 0x172   :  { %v1766_v32 = vmul.f32 2.0, %v383_v31  ;;  %v1091_v33 = vpop.f32.mrb[3].mxu0 }
 0x174   :  { %v388_v35 = vsel %vm109_vm8, %v1766_v32, -inf }
 0x175   :  { %389 = vmax.xlane.f32.xlu0 %v388_v35 }
 0x187   :  { %v1829_v11 = vpop.xlane.xlu0 %111 }
 0x188   :  { %v113_v16 = vsub.f32 %v1758_v25, %v1829_v11  ;;  %v689_v25 = vld [vmem:[%s1916_s3 + $0x1c] sm:$0x1] }
 0x189   :  { %v716_v28 = vrot.slane %v689_v25, 1 }
 0x18a   :  { %v114_v21 = vmul.f32 1.442695, %v113_v16 }
 0x18b   :  { %v718_v3 = vsel %vm717_vm7, %v716_v28, %v715_v30 }
 0x18c   :  { %1456 = vpow2.f32 %v114_v21  ;;  %v720_v33 = vmul.f32 %v718_v3, %v1643_v34 }
 0x18d   :  { %v519_v57 = vpop.f32.mrb[2].mxu1 }
 0x18e   :  { %v1800_v14 = vmul.f32 2.0, %v519_v57  ;;  %v1126_v58 = vpop.f32.mrb[3].mxu1 }
 0x190   :  { %v524_v60 = vsel %vm109_vm8, %v1800_v14, -inf }
 0x191   :  { %525 = vmax.xlane.f32.xlu0 %v524_v60  ;;  %v658_v61 = vpop.f32.mrb[4].mxu0 }
 0x192   :  { %v1806_v63 = vmul.f32 2.0, %v658_v61  ;;  %v1161_v0 = vpop.f32.mrb[5].mxu0 }
 0x194   :  { %v663_v1 = vsel %vm109_vm8, %v1806_v63, -inf }
 0x195   :  { %850 = vadd.xlane.f32.xlu0 %v849_v62  ;;  %664 = vmax.xlane.f32.xlu1 %v663_v1 }
 0x196   :  { %v1457_v31 = vpop.eup %1456 }
 0x197   :  { %v116_v35 = vsel %vm109_vm8, %v1457_v31, 0.0 }
 0x1a6   :  { %536 = vrot.lane.b32.xlu1 %v399_v2, %s1511_s30 }
 0x1ab   :  { %674 = vrot.lane.b32.xlu0 %v399_v2, %s1512_s6 }
 0x1ca   :  { %117 = vadd.xlane.f32.xlu0 %v116_v35  ;;  %721 = vadd.xlane.f32.xlu1 %v720_v33 }
 0x1fe   :  { %v256_v37 = vpop.xlane.xlu1 %255 }
 0x1ff   :  { %v1855_v38 = vmax.f32 %v1829_v11, %v256_v37 }
 0x201   :  { %v262_v39 = vsub.f32 %v1762_v29, %v1855_v38  ;;  %v258_v28 = vsub.f32 %v1829_v11, %v1855_v38 }
 0x202   :  { %v390_v40 = vpop.xlane.xlu0 %389 }
 0x203   :  { %v263_v41 = vmul.f32 1.442695, %v262_v39  ;;  %v1860_v42 = vmax.f32 %v1855_v38, %v390_v40  ;;  %v259_v30 = vmul.f32 1.442695, %v258_v28 }
 0x205   :  { %v392_v34 = vsub.f32 %v1855_v38, %v1860_v42  ;;  %v396_v43 = vsub.f32 %v1766_v32, %v1860_v42  ;;  %1458 = vpow2.f32 %v263_v41 }
 0x207   :  { %v397_v44 = vmul.f32 1.442695, %v396_v43  ;;  %v393_v3 = vmul.f32 1.442695, %v392_v34 }
 0x209   :  { %1460 = vpow2.f32 %v397_v44 }
 0x20f   :  { %v1459_v45 = vpop.eup %1458 }
 0x210   :  { %v265_v46 = vsel %vm109_vm8, %v1459_v45, 0.0 }
 0x211   :  { %266 = vadd.xlane.f32.xlu1 %v265_v46 }
 0x213   :  { %v1461_v47 = vpop.eup %1460 }
 0x214   :  { %v400_v29 = vmul.f32 %v1461_v47, %v399_v2 }
 0x216   :  { %v401_v48 = vsel %vm109_vm8, %v400_v29, 0.0 }
 0x217   :  { %402 = vadd.xlane.f32.xlu0 %v401_v48 }
 0x21e   :  { %v526_v49 = vpop.xlane.xlu0 %525 }
 0x21f   :  { %v1869_v50 = vmax.f32 %v1860_v42, %v526_v49 }
 0x221   :  { %v528_v51 = vsub.f32 %v1860_v42, %v1869_v50  ;;  %v532_v32 = vsub.f32 %v1800_v14, %v1869_v50 }
 0x222   :  { %v665_v52 = vpop.xlane.xlu1 %664  ;;  %v851_v58 = vpop.xlane.xlu0 %850 }
 0x223   :  { %v533_v53 = vmul.f32 1.442695, %v532_v32  ;;  %v1876_v54 = vmax.f32 %v1869_v50, %v665_v52  ;;  %v852_v60 = vmul.f32 2.0, %v851_v58  ;;  %v529_v31 = vmul.f32 1.442695, %v528_v51 }
 0x225   :  { %v671_v55 = vsub.f32 %v1806_v63, %v1876_v54  ;;  %1462 = vpow2.f32 %v533_v53  ;;  %v667_v56 = vsub.f32 %v1869_v50, %v1876_v54  ;;  %v765_v14 = vsub.f32 %v764_v59, %v1876_v54 }
 0x226   :  { %v537_v61 = vpop.permute.xlu1 %536  ;;  %v675_v1 = vpop.permute.xlu0 %674  ;;  %v853_v4 = vsub.f32 %v852_v60, %v1876_v54  ;;  %v809_v10 = vsub.f32 %v808_v7, %v1876_v54  ;;  %v868_v60 = vlaneseq }
 0x227   :  { %v672_v57 = vmul.f32 1.442695, %v671_v55  ;;  %v766_v2 = vmul.f32 1.442695, %v765_v14  ;;  %v668_v46 = vmul.f32 1.442695, %v667_v56 }
 0x228   :  { %v854_v5 = vmul.f32 1.442695, %v853_v4  ;;  %v810_v12 = vmul.f32 1.442695, %v809_v10  ;;  %v871_v14 = vand.u32 127, %v868_v60 }
 0x229   :  { %1464 = vpow2.f32 %v672_v57 }
 0x22a   :  { %1466 = vpow2.f32 %v766_v2 }
 0x22b   :  { %1468 = vpow2.f32 %v854_v5 }
 0x22c   :  { %1470 = vpow2.f32 %v810_v12 }
 0x22f   :  { %v1463_v62 = vpop.eup %1462 }
 0x230   :  { %v539_v0 = vmul.f32 %v1463_v62, %v537_v61  ;;  %v869_v61 = vshrl.u32 %v868_v60, 7 }
 0x232   :  { %v540_v6 = vsel %vm109_vm8, %v539_v0, 0.0  ;;  %vm872_vm9 = vcmp.eq.s32.totalorder %v869_v61, %v871_v14 }
 0x233   :  { %v1465_v63 = vpop.eup %1464  ;;  %541 = vadd.xlane.f32.xlu1 %v540_v6 }
 0x234   :  { %v677_v8 = vmul.f32 %v1465_v63, %v675_v1  ;;  %v1467_v13 = vpop.eup %1466 }
 0x235   :  { %v768_v16 = vmul.f32 %v1467_v13, %v724_v15  ;;  %v1469_v17 = vpop.eup %1468 }
 0x236   :  { %v678_v9 = vsel %vm109_vm8, %v677_v8, 0.0  ;;  %v856_v18 = vmul.f32 %v1469_v17, %v724_v15  ;;  %v1471_v19 = vpop.eup %1470 }
 0x237   :  { %679 = vadd.xlane.f32.xlu0 %v678_v9  ;;  %v812_v20 = vmul.f32 %v1471_v19, %v724_v15 }
 0x244   :  { %770 = vrot.lane.b32.xlu1 %v768_v16, %s1517_s20 }
 0x248   :  { %858 = vrot.lane.b32.xlu1 %v856_v18, %s1518_s21 }
 0x24d   :  { %814 = vrot.lane.b32.xlu0 %v812_v20, %s1519_s22 }
 0x257   :  { %v722_v21 = vpop.xlane.xlu1 %721  ;;  %v118_v33 = vpop.xlane.xlu0 %117 }
 0x258   :  { %v723_v22 = vmul.f32 2.0, %v722_v21 }
 0x25a   :  { %v725_v23 = vsub.f32 %v723_v22, %v1876_v54 }
 0x25c   :  { %v726_v25 = vmul.f32 1.442695, %v725_v23 }
 0x25e   :  { %1472 = vpow2.f32 %v726_v25 }
 0x25f   :  { %1474 = vpow2.f32 %v259_v30 }
 0x260   :  { %1476 = vpow2.f32 %v393_v3 }
 0x261   :  { %1478 = vpow2.f32 %v529_v31 }
 0x262   :  { %1480 = vpow2.f32 %v668_v46 }
 0x268   :  { %v1473_v26 = vpop.eup %1472 }
 0x269   :  { %v728_v27 = vmul.f32 %v1473_v26, %v724_v15  ;;  %v1475_v35 = vpop.eup %1474 }
 0x26a   :  { %v261_v36 = vmul.f32 %v1475_v35, %v118_v33  ;;  %v1477_v40 = vpop.eup %1476 }
 0x26b   :  { %v1479_v45 = vpop.eup %1478 }
 0x26c   :  { %v1481_v34 = vpop.eup %1480 }
 0x29e   :  { %v267_v37 = vpop.xlane.xlu1 %266 }
 0x29f   :  { %v268_v39 = vadd.f32 %v267_v37, %v261_v36 }
 0x2a1   :  { %v395_v41 = vmul.f32 %v1477_v40, %v268_v39 }
 0x2a4   :  { %v403_v43 = vpop.xlane.xlu0 %402 }
 0x2a5   :  { %v404_v44 = vadd.f32 %v403_v43, %v395_v41 }
 0x2a7   :  { %v531_v11 = vmul.f32 %v1479_v45, %v404_v44 }
 0x2c0   :  { %v542_v38 = vpop.xlane.xlu1 %541 }
 0x2c1   :  { %v543_v42 = vadd.f32 %v542_v38, %v531_v11 }
 0x2c3   :  { %v670_v29 = vmul.f32 %v1481_v34, %v543_v42 }
 0x2c4   :  { %v680_v47 = vpop.xlane.xlu0 %679  ;;  %v771_v48 = vpop.permute.xlu1 %770 }
 0x2c5   :  { %v773_v49 = vadd.f32 %v771_v48, %v728_v27  ;;  %v681_v53 = vadd.f32 %v680_v47, %v670_v29 }
 0x2c8   :  { %v815_v51 = vpop.permute.xlu0 %814  ;;  %v859_v52 = vpop.permute.xlu1 %858 }
 0x2c9   :  { %v817_v32 = vadd.f32 %v815_v51, %v773_v49 }
 0x2cb   :  { %v861_v55 = vadd.f32 %v859_v52, %v817_v32 }
 0x2cd   :  { %v862_v57 = vsub.f32 %v681_v53, %v861_v55  ;;  %1482 = vlog2.f32 %v861_v55 }
 0x2cf   :  { %1484 = vlog2.f32 %v862_v57 }
 0x2d7   :  { %v1483_v58 = vpop.eup %1482 }
 0x2d8   :  { %v866_v54 = vmul.f32 0.6931472, %v1483_v58 }
 0x2d9   :  { %v1485_v59 = vpop.eup %1484 }
 0x2da   :  { %v864_v50 = vmul.f32 0.6931472, %v1485_v59 }
 0x2dc   :  { %v867_v56 = vsub.f32 %v864_v50, %v866_v54 }
 0x2de   :  { %875 = vperm.xlu1 %1454, %v867_v56  }
 0x35d   :  { %v876_v62 = vpop.permute.xlu1 %875 }
 0x35e   :  { %v878_v0 = vsel %vm872_vm9, %v876_v62, 0.0 }
 0x35f   :  { %v879_v1 = vsel %vm109_vm8, %v878_v0, 0.0 }
 0x360   :  { %v880_v2 = vrot.slane %v879_v1, 4 }
 0x362   :  { %v881_v4 = vadd.f32 %v880_v2, %v879_v1 }
 0x364   :  { %v882_v63 = vrot.slane %v881_v4, 2 }
 0x366   :  { %v883_v6 = vadd.f32 %v882_v63, %v881_v4 }
 0x368   :  { %v884_v7 = vrot.slane %v883_v6, 1 }
 0x36a   :  { %v885_v8 = vadd.f32 %v884_v7, %v883_v6 }
 0x36c   :  { %887 = vst.msk [vmem:[#allocation2] sm:$0x1] %vm886_vm10, %v885_v8 }
 0x36d   :  { %1497 = shalt.err (!%p1494_p4)
}
 0x36e   :  { %s1498_s27 = scalar_lea.hbm %s1918_s5, 16 }
 0x36f   :  { %p1499_p5 = scmp.ne.s32.totalorder %s1918_s5, %s1498_s27  ;;  %p1502_p6 = scmp.lt.u32.totalorder %s1498_s27, %s1918_s5 }
 0x371   :  { %p1504_p7 = pnand %p1502_p6, %p1499_p5 }
 0x373   :  { %1507 = shalt.err (!%p1504_p7)
}
 0x374   :  { %897 = dma.vmem_to_hbm [thread:$0]  %s895_s23, 16, %s1918_s5, [#allocation3]  }
 0x375   :  { %1508 = dma.done.wait [#allocation3], 16  }
 0x376   :  { %1509 = vsyncadd [#allocation3], 4294967280 }
 0x377   :  { %901 = vsyncpa [#allocation3], 1 }

</bundles_post_ra>
